<compile_context>
chip_gen: v7x
topology: tpu7x:2x2x1
jax: 0.10.0
libtpu: 0.0.40
codegen_flags: <defaults>
</compile_context>

<pallas_src>
import jax
import jax.numpy as jnp
from jax.experimental import pallas as pl
from jax.experimental.pallas import tpu as pltpu


def _round_up(x: int, m: int) -> int:
    return ((x + m - 1) // m) * m


def _choose_tk(d_pad: int, tk_max: int) -> int:
    """Largest multiple-of-128 divisor of d_pad that is <= tk_max."""
    if d_pad <= tk_max:
        return d_pad
    best = 128
    t = 128
    while t <= tk_max:
        if d_pad % t == 0:
            best = t
        t += 128
    return best


def prepare_linear_params(weight, bias, *, stream_dtype=jnp.bfloat16):
    """One-time parameter prep (hoisted out of the per-call path).

    weight: (num_classes, input_dim), bias: (num_classes,)
    Returns:
      w_t:      (d_pad, num_classes)  transposed, K padded to mult of 128, bf16
      bias_row: (1, num_classes)      f32 (added in f32 in the finalize step)
    Note: casting the streamed weight to bf16 loosens numerics slightly
    (f32 accumulation is kept on the MXU).
    """
    num_classes, input_dim = weight.shape
    d_pad = _round_up(input_dim, 128)
    w = jnp.asarray(weight, jnp.float32)
    if d_pad != input_dim:
        w = jnp.pad(w, ((0, 0), (0, d_pad - input_dim)))
    w_t = w.T.astype(stream_dtype)                       # (d_pad, C) native RHS layout
    bias_row = jnp.asarray(bias, jnp.float32).reshape(1, num_classes)
    return w_t, bias_row


def _linear_kernel(x_ref, w_ref, b_ref, o_ref, acc_ref):
    # x_ref: (tb, tk)  w_ref: (tk, C) bf16  b_ref: (1, C) f32
    # o_ref: (tb, C)   acc_ref: (tb, C) f32 scratch
    k = pl.program_id(1)

    @pl.when(k == 0)
    def _():
        acc_ref[...] = jnp.zeros_like(acc_ref)

    # bf16 x bf16 MXU matmul with f32 accumulation; x tile downcast in-kernel
    # (cheap VALU cast, avoids materializing a bf16 copy of x in HBM).
    acc_ref[...] += jnp.dot(
        x_ref[...].astype(w_ref.dtype), w_ref[...],
        preferred_element_type=jnp.float32,
    )

    @pl.when(k == pl.num_programs(1) - 1)
    def _():
        o_ref[...] = (acc_ref[...] + b_ref[...]).astype(o_ref.dtype)


def linear_classifier_forward(x_nchw, w_t, bias_row, *, tk_max=8192, tb_max=256):
    """x_nchw: (b, 3, H, W); w_t: (d_pad, C) prepared; bias_row: (1, C)."""
    b = x_nchw.shape[0]
    x_flat = x_nchw.reshape(b, -1)                 # row-major flatten == torch .view
    input_dim = x_flat.shape[1]
    d_pad, num_classes = w_t.shape

    # ---- tile sizes ------------------------------------------------------
    tk = _choose_tk(d_pad, tk_max)                 # multiple of 128, divides d_pad
    tb = min(_round_up(b, 8), tb_max)              # sublane-aligned batch tile
    b_pad = _round_up(b, tb)

    # Pad x only when actually needed (avoid per-call HBM copy of x).
    if b_pad != b or d_pad != input_dim:
        x_flat = jnp.pad(x_flat, ((0, b_pad - b), (0, d_pad - input_dim)))

    grid = (b_pad // tb, d_pad // tk)

    out_p = pl.pallas_call(
        _linear_kernel,
        out_shape=jax.ShapeDtypeStruct((b_pad, num_classes), x_flat.dtype),
        grid_spec=pltpu.PrefetchScalarGridSpec(
            num_scalar_prefetch=0,
            grid=grid,
            in_specs=[
                pl.BlockSpec((tb, tk), lambda i, k: (i, k)),            # x tile
                pl.BlockSpec((tk, num_classes), lambda i, k: (k, 0)),   # weight (D, C)
                pl.BlockSpec((1, num_classes), lambda i, k: (0, 0)),    # bias row
            ],
            out_specs=pl.BlockSpec((tb, num_classes), lambda i, k: (i, 0)),
            scratch_shapes=[pltpu.VMEM((tb, num_classes), jnp.float32)],
        ),
        compiler_params=pltpu.CompilerParams(
            # Independent batch blocks -> parallel; K reduction into the scratch
            # accumulator -> arbitrary, last axis.
            dimension_semantics=("parallel", "arbitrary"),
            vmem_limit_bytes=48 * 1024 * 1024,
        ),
    )(x_flat, w_t, bias_row)

    return out_p[:b] if b_pad != b else out_p


if __name__ == "__main__":
    # Small shapes consistent with the module: h=w=16 -> input_dim = 3*16*16 = 768
    H = W = 16
    num_classes = 6
    batch = 2
    input_dim = 3 * H * W

    key = jax.random.PRNGKey(0)
    kx, kw, kb = jax.random.split(key, 3)

    # Deterministic init mimicking nn.Linear default: U(-1/sqrt(in), 1/sqrt(in))
    bound = 1.0 / jnp.sqrt(jnp.float32(input_dim))
    weight = jax.random.uniform(kw, (num_classes, input_dim), jnp.float32, -bound, bound)
    bias = jax.random.uniform(kb, (num_classes,), jnp.float32, -bound, bound)

    x = jax.random.normal(kx, (batch, 3, H, W), jnp.float32)

    # One-time parameter prep (transpose + K-pad + bf16 cast), then forward.
    w_t, bias_row = prepare_linear_params(weight, bias)
    out = linear_classifier_forward(x, w_t, bias_row)
    out = jax.block_until_ready(out)

    # Cross-check: (a) against a reference computed with matching bf16 streamed
    # operands / f32 accumulation, (b) loosely against the full-f32 reference.
    x_flat = x.reshape(batch, -1)
    ref_bf16 = (jnp.dot(x_flat.astype(w_t.dtype), w_t,
                        preferred_element_type=jnp.float32) + bias_row).astype(x.dtype)
    ref_f32 = x_flat @ weight.T + bias

    assert out.shape == (batch, num_classes)
    assert jnp.allclose(out, ref_bf16, atol=1e-3, rtol=1e-3)
    assert jnp.allclose(out, ref_f32, atol=5e-2, rtol=5e-2)

    print("KERNEL_OK")
</pallas_src>

<mosaic_0001>
module attributes {stable_mosaic.version = 11 : i64} {
  func.func @_linear_kernel(%arg0: i32, %arg1: i32, %arg2: memref<8x768xf32, #tpu.memory_space<vmem>>, %arg3: memref<768x6xbf16, #tpu.memory_space<vmem>>, %arg4: memref<1x6xf32, #tpu.memory_space<vmem>>, %arg5: memref<8x6xf32, #tpu.memory_space<vmem>>, %arg6: memref<8x6xf32, #tpu.memory_space<vmem>>) attributes {dimension_semantics = [#tpu.dimension_semantics<parallel>, #tpu.dimension_semantics<arbitrary>], iteration_bounds = array<i64: 1, 1>, scalar_prefetch = 0 : i64, scratch_operands = 1 : i64, tpu.core_type = #tpu.core_type<tc>, window_params = [{transform_indices = @transform_0, window_bounds = array<i64: 8, 768>}, {transform_indices = @transform_1, window_bounds = array<i64: 768, 6>}, {pipeline_mode = #tpu.pipeline_mode<synchronous>, transform_indices = @transform_2, window_bounds = array<i64: 1, 6>}, {transform_indices = @transform_3, window_bounds = array<i64: 8, 6>}]} {
    %c0_i32 = arith.constant 0 : i32
    %0 = arith.cmpi eq, %arg1, %c0_i32 : i32
    %1 = arith.extui %0 : i1 to i32
    %c0_i32_0 = arith.constant 0 : i32
    %2 = arith.cmpi ne, %1, %c0_i32_0 : i32
    scf.if %2 {
      %cst_10 = arith.constant 0.000000e+00 : f32
      %13 = vector.broadcast %cst_10 : f32 to vector<8x6xf32>
      %c0_11 = arith.constant 0 : index
      %c0_12 = arith.constant 0 : index
      %14 = vector.load %arg6[%c0_11, %c0_12] : memref<8x6xf32, #tpu.memory_space<vmem>>, vector<8x6xf32>
      tpu.vector_store %arg6[%c0_11, %c0_12], %13 {strides = array<i32>} : memref<8x6xf32, #tpu.memory_space<vmem>>, vector<8x6xf32>,
    } else {
    }
    %c0 = arith.constant 0 : index
    %c0_1 = arith.constant 0 : index
    %3 = vector.load %arg6[%c0, %c0_1] : memref<8x6xf32, #tpu.memory_space<vmem>>, vector<8x6xf32>
    %c0_2 = arith.constant 0 : index
    %c0_3 = arith.constant 0 : index
    %4 = vector.load %arg2[%c0_2, %c0_3] : memref<8x768xf32, #tpu.memory_space<vmem>>, vector<8x768xf32>
    %5 = arith.truncf %4 : vector<8x768xf32> to vector<8x768xbf16>
    %c0_4 = arith.constant 0 : index
    %c0_5 = arith.constant 0 : index
    %6 = vector.load %arg3[%c0_4, %c0_5] : memref<768x6xbf16, #tpu.memory_space<vmem>>, vector<768x6xbf16>
    %cst = arith.constant dense<0.000000e+00> : vector<8x6xf32>
    %7 = tpu.matmul %5, %6, %cst {dimension_numbers = #tpu.dot_dimension_numbers<[1], [0], [0], [1], [0, 0, 1, 1], [], []>} : vector<8x768xbf16>, vector<768x6xbf16>, vector<8x6xf32> -> vector<8x6xf32>
    %8 = arith.addf %3, %7 : vector<8x6xf32>
    %c0_6 = arith.constant 0 : index
    %c0_7 = arith.constant 0 : index
    %9 = vector.load %arg6[%c0_6, %c0_7] : memref<8x6xf32, #tpu.memory_space<vmem>>, vector<8x6xf32>
    tpu.vector_store %arg6[%c0_6, %c0_7], %8 {strides = array<i32>} : memref<8x6xf32, #tpu.memory_space<vmem>>, vector<8x6xf32>,
    %c0_i32_8 = arith.constant 0 : i32
    %10 = arith.cmpi eq, %arg1, %c0_i32_8 : i32
    %11 = arith.extui %10 : i1 to i32
    %c0_i32_9 = arith.constant 0 : i32
    %12 = arith.cmpi ne, %11, %c0_i32_9 : i32
    scf.if %12 {
      %c0_10 = arith.constant 0 : index
      %c0_11 = arith.constant 0 : index
      %13 = vector.load %arg6[%c0_10, %c0_11] : memref<8x6xf32, #tpu.memory_space<vmem>>, vector<8x6xf32>
      %c0_12 = arith.constant 0 : index
      %c0_13 = arith.constant 0 : index
      %14 = vector.load %arg4[%c0_12, %c0_13] : memref<1x6xf32, #tpu.memory_space<vmem>>, vector<1x6xf32>
      %15 = vector.broadcast %14 : vector<1x6xf32> to vector<8x6xf32>
      %16 = arith.addf %13, %15 : vector<8x6xf32>
      %c0_14 = arith.constant 0 : index
      %c0_15 = arith.constant 0 : index
      %17 = vector.load %arg5[%c0_14, %c0_15] : memref<8x6xf32, #tpu.memory_space<vmem>>, vector<8x6xf32>
      tpu.vector_store %arg5[%c0_14, %c0_15], %16 {strides = array<i32>} : memref<8x6xf32, #tpu.memory_space<vmem>>, vector<8x6xf32>,
    } else {
    }
    return
  }
  func.func @transform_0(%arg0: i32, %arg1: i32) -> (i32, i32) {
    %c0_i32 = arith.constant 0 : i32
    return %arg0, %arg1 : i32, i32
  }
  func.func @transform_1(%arg0: i32, %arg1: i32) -> (i32, i32) {
    %c0_i32 = arith.constant 0 : i32
    %c0_i32_0 = arith.constant 0 : i32
    return %arg1, %c0_i32 : i32, i32
  }
  func.func @transform_2(%arg0: i32, %arg1: i32) -> (i32, i32) {
    %c0_i32 = arith.constant 0 : i32
    %c0_i32_0 = arith.constant 0 : i32
    %c0_i32_1 = arith.constant 0 : i32
    return %c0_i32, %c0_i32_0 : i32, i32
  }
  func.func @transform_3(%arg0: i32, %arg1: i32) -> (i32, i32) {
    %c0_i32 = arith.constant 0 : i32
    %c0_i32_0 = arith.constant 0 : i32
    return %arg0, %c0_i32 : i32, i32
  }
}

</mosaic_0001>

<bundles_post_ra>
// kernel: tpu_custom_call.1
= control target key start
LH: loop header
LB: loop body
LE: loop exit
PB: predicated region body
PF: predicated region fallthrough
CT: control target
= control target key end

     0   :  { %s960_s0 = inlined_call_operand.vmem [shape: f32[8,768], index: 0, kind: input, shape index: {}]   ;;  %s961_s1 = inlined_call_operand.vmem [shape: bf16[768,6], index: 1, kind: input, shape index: {}]   ;;  %s962_s2 = inlined_call_operand.vmem [shape: f32[1,6], index: 2, kind: input, shape index: {}]   ;;  %s963_s3 = inlined_call_operand.hbm [shape: f32[8,6], index: 3, kind: output, shape index: {}]  }
   0x1   :  { %v686_v0 = vld [vmem:[%s961_s1 + $0x40] sm:$0xff]   ;;  %v690_v4 = vld [vmem:[%s961_s1 + $0x48] sm:$0xff]   ;;  %v694_v8 = vld [vmem:[%s961_s1 + $0x50] sm:$0xff]  }
   0x2   :  { %v687_v1 = vld [vmem:[%s961_s1 + $0xc0] sm:$0xff]   ;;  %618 = vmatprep.subr.bf16.mxu0 %v686_v0  ;;  %v691_v5 = vld [vmem:[%s961_s1 + $0xc8] sm:$0xff]   ;;  %v695_v9 = vld [vmem:[%s961_s1 + $0xd0] sm:$0xff]  }
   0x3   :  { %v688_v2 = vld [vmem:[%s961_s1] sm:$0xff]   ;;  %640 = vmatprep.subr.bf16.mxu1 %v687_v1  ;;  %v692_v6 = vld [vmem:[%s961_s1 + $0x8] sm:$0xff]   ;;  %v696_v10 = vld [vmem:[%s961_s1 + $0x10] sm:$0xff]  }
   0x4   :  { %v689_v3 = vld [vmem:[%s961_s1 + $0x80] sm:$0xff]   ;;  %619 = vmatpush3.bf16.msra.mxu0 %v688_v2  ;;  %v693_v7 = vld [vmem:[%s961_s1 + $0x88] sm:$0xff]   ;;  %v697_v11 = vld [vmem:[%s961_s1 + $0x90] sm:$0xff]  }
   0x5   :  { %641 = vmatpush3.bf16.msra.mxu1 %v689_v3  ;;  %620 = vmatprep.subr.bf16.mxu0 %v690_v4  ;;  %v698_v12 = vld [vmem:[%s961_s1 + $0x58] sm:$0xff]   ;;  %v702_v16 = vld [vmem:[%s961_s1 + $0x60] sm:$0xff]   ;;  %v706_v20 = vld [vmem:[%s961_s1 + $0x68] sm:$0xff]  }
   0x6   :  { %642 = vmatprep.subr.bf16.mxu1 %v691_v5  ;;  %v699_v13 = vld [vmem:[%s961_s1 + $0xd8] sm:$0xff]   ;;  %v703_v17 = vld [vmem:[%s961_s1 + $0xe0] sm:$0xff]   ;;  %v707_v21 = vld [vmem:[%s961_s1 + $0xe8] sm:$0xff]  }
   0x7   :  { %v700_v14 = vld [vmem:[%s961_s1 + $0x18] sm:$0xff]   ;;  %v704_v18 = vld [vmem:[%s961_s1 + $0x20] sm:$0xff]   ;;  %v708_v22 = vld [vmem:[%s961_s1 + $0x28] sm:$0xff]  }
   0x8   :  { %621 = vmatpush3.bf16.msra.mxu0 %v692_v6  ;;  %v701_v15 = vld [vmem:[%s961_s1 + $0x98] sm:$0xff]   ;;  %v705_v19 = vld [vmem:[%s961_s1 + $0xa0] sm:$0xff]   ;;  %v709_v23 = vld [vmem:[%s961_s1 + $0xa8] sm:$0xff]  }
   0x9   :  { %643 = vmatpush3.bf16.msra.mxu1 %v693_v7  ;;  %622 = vmatprep.subr.bf16.mxu0 %v694_v8  ;;  %v710_v24 = vld [vmem:[%s961_s1 + $0x70] sm:$0xff]   ;;  %v714_v28 = vld [vmem:[%s961_s1 + $0x78] sm:$0xff]   ;;  %v24_v32 = vld [vmem:[%s960_s0 + $0x8] sm:$0xff] }
   0xa   :  { %644 = vmatprep.subr.bf16.mxu1 %v695_v9  ;;  %v711_v25 = vld [vmem:[%s961_s1 + $0xf0] sm:$0xff]   ;;  %v715_v29 = vld [vmem:[%s961_s1 + $0xf8] sm:$0xff]   ;;  %v23_v34 = vld [vmem:[%s960_s0] sm:$0xff]  ;;  %v30_v35 = vpack.c.bf16 %v24_v32, %v24_v32 }
   0xb   :  { %v712_v26 = vld [vmem:[%s961_s1 + $0x30] sm:$0xff]   ;;  %v716_v30 = vld [vmem:[%s961_s1 + $0x38] sm:$0xff]   ;;  %v29_v37 = vpack.c.bf16 %v23_v34, %v23_v34  ;;  %v718_v40 = vld [vmem:[%s961_s1 + $0x140] sm:$0xff]  }
   0xc   :  { %623 = vmatpush3.bf16.msra.mxu0 %v696_v10  ;;  %v713_v27 = vld [vmem:[%s961_s1 + $0xb0] sm:$0xff]   ;;  %v717_v31 = vld [vmem:[%s961_s1 + $0xb8] sm:$0xff]   ;;  %451 = vmatprep.mubr.bf16.mxu0 %v30_v35  ;;  %v719_v41 = vld [vmem:[%s961_s1 + $0x100] sm:$0xff]  }
   0xd   :  { %645 = vmatpush3.bf16.msra.mxu1 %v697_v11  ;;  %624 = vmatprep.subr.bf16.mxu0 %v698_v12  ;;  %v26_v33 = vld [vmem:[%s960_s0 + $0x18] sm:$0xff]  ;;  %v25_v38 = vld [vmem:[%s960_s0 + $0x10] sm:$0xff]  ;;  %v720_v42 = vld [vmem:[%s961_s1 + $0x148] sm:$0xff]  }
   0xe   :  { %646 = vmatprep.subr.bf16.mxu1 %v699_v13  ;;  %v32_v36 = vpack.c.bf16 %v26_v33, %v26_v33  ;;  %v31_v39 = vpack.c.bf16 %v25_v38, %v25_v38  ;;  %v721_v43 = vld [vmem:[%s961_s1 + $0x108] sm:$0xff]   ;;  %v722_v44 = vld [vmem:[%s961_s1 + $0x150] sm:$0xff]   ;;  %v724_v46 = vld [vmem:[%s961_s1 + $0x158] sm:$0xff]  }
   0xf   :  { %v723_v45 = vld [vmem:[%s961_s1 + $0x110] sm:$0xff]   ;;  %v725_v47 = vld [vmem:[%s961_s1 + $0x118] sm:$0xff]   ;;  %v726_v48 = vld [vmem:[%s961_s1 + $0x160] sm:$0xff]  }
  0x10   :  { %625 = vmatpush3.bf16.msra.mxu0 %v700_v14  ;;  %491 = vmatprep.mubr.bf16.mxu1 %v32_v36  ;;  %v28_v49 = vld [vmem:[%s960_s0 + $0x28] sm:$0xff]  ;;  %v727_v50 = vld [vmem:[%s961_s1 + $0x120] sm:$0xff]  }
  0x11   :  { %647 = vmatpush3.bf16.msra.mxu1 %v701_v15  ;;  %626 = vmatprep.subr.bf16.mxu0 %v702_v16  ;;  %v34_v51 = vpack.c.bf16 %v28_v49, %v28_v49 }
  0x12   :  { %648 = vmatprep.subr.bf16.mxu1 %v703_v17 }
  0x14   :  { %627 = vmatpush3.bf16.msra.mxu0 %v704_v18 }
  0x15   :  { %649 = vmatpush3.bf16.msra.mxu1 %v705_v19  ;;  %628 = vmatprep.subr.bf16.mxu0 %v706_v20 }
  0x16   :  { %650 = vmatprep.subr.bf16.mxu1 %v707_v21 }
  0x18   :  { %629 = vmatpush3.bf16.msra.mxu0 %v708_v22 }
  0x19   :  { %651 = vmatpush3.bf16.msra.mxu1 %v709_v23  ;;  %630 = vmatprep.subr.bf16.mxu0 %v710_v24 }
  0x1a   :  { %652 = vmatprep.subr.bf16.mxu1 %v711_v25 }
  0x1c   :  { %631 = vmatpush3.bf16.msra.mxu0 %v712_v26 }
  0x1d   :  { %653 = vmatpush3.bf16.msra.mxu1 %v713_v27  ;;  %632 = vmatprep.subr.bf16.mxu0 %v714_v28 }
  0x1e   :  { %654 = vmatprep.subr.bf16.mxu1 %v715_v29 }
  0x20   :  { %633 = vmatpush3.bf16.msra.mxu0 %v716_v30 }
  0x21   :  { %655 = vmatpush3.bf16.msra.mxu1 %v717_v31  ;;  %662 = vmatprep.subr.bf16.mxu0 %v718_v40 }
  0x23   :  { %452 = vmatmul.mubr.bf16.vlgmr.msra.gmra.mrb[0].mxu0 %v29_v37 }
  0x24   :  { %492 = vmatmul.mubr.bf16.vlgmr.msra.gmra.mrb[0].mxu1 %v31_v39  ;;  %663 = vmatpush3.bf16.msra.mxu0 %v719_v41 }
  0x25   :  { %664 = vmatprep.subr.bf16.mxu0 %v720_v42 }
  0x28   :  { %665 = vmatpush3.bf16.msra.mxu0 %v721_v43 }
  0x29   :  { %666 = vmatprep.subr.bf16.mxu0 %v722_v44 }
  0x2c   :  { %667 = vmatpush3.bf16.msra.mxu0 %v723_v45 }
  0x2d   :  { %668 = vmatprep.subr.bf16.mxu0 %v724_v46 }
  0x30   :  { %669 = vmatpush3.bf16.msra.mxu0 %v725_v47 }
  0x31   :  { %8 = vsyncpa [#allocation4], 0  ;;  %670 = vmatprep.subr.bf16.mxu0 %v726_v48  ;;  %v728_v52 = vld [vmem:[%s961_s1 + $0x168] sm:$0xff]   ;;  %531 = vmatprep.mubr.bf16.mxu0 %v34_v51  ;;  %v730_v54 = vld [vmem:[%s961_s1 + $0x170] sm:$0xff]   ;;  %vm20_vm0 = vcmask 48128   ;;  %v758_v60 = vmov 0.0  }
  0x32   :  { %v729_v53 = vld [vmem:[%s961_s1 + $0x128] sm:$0xff]   ;;  %v731_v55 = vld [vmem:[%s961_s1 + $0x130] sm:$0xff]   ;;  %v732_v56 = vld [vmem:[%s961_s1 + $0x178] sm:$0xff]   ;;  %21 = vst.msk [vmem:[#allocation2] sm:$0xff] %vm20_vm0, %v758_v60  ;;  %s759_s12 = smov [#allocation3]  }
  0x33   :  { %v733_v57 = vld [vmem:[%s961_s1 + $0x138] sm:$0xff]   ;;  %v27_v58 = vld [vmem:[%s960_s0 + $0x20] sm:$0xff]  ;;  %s561_s13 = sshll.u32 %s759_s12, 4  ;;  %s562_s13 = int_to_ptr.vmem [resolvable:$true] %s561_s13 }
  0x34   :  { %671 = vmatpush3.bf16.msra.mxu0 %v727_v50  ;;  %v33_v59 = vpack.c.bf16 %v27_v58, %v27_v58  ;;  %v617_v16 = vld [vmem:[%s962_s2] ss:$0 sm:$0xff]  ;;  %s734_s14 = scalar_lea.vmem %s562_s13, 128  ;;  %p739_p1 = scmp.lt.s32.totalorder %s562_s13, %s562_s13 }
  0x35   :  { %672 = vmatprep.subr.bf16.mxu0 %v728_v52  ;;  %p735_p0 = scmp.ne.s32.totalorder %s562_s13, %s734_s14  ;;  %p740_p2 = scmp.lt.s32.totalorder %s734_s14, %s734_s14 }
  0x37   :  { %p741_p3 = por %p740_p2, %p739_p1 }
  0x38   :  { %673 = vmatpush3.bf16.msra.mxu0 %v729_v53 }
  0x39   :  { %674 = vmatprep.subr.bf16.mxu0 %v730_v54  ;;  %v22_v13 = vld [vmem:[#allocation2] sm:$0xff]  ;;  %p742_p4 = pnand %p741_p3, %p735_p0 }
  0x3c   :  { %675 = vmatpush3.bf16.msra.mxu0 %v731_v55 }
  0x3d   :  { %676 = vmatprep.subr.bf16.mxu0 %v732_v56 }
  0x40   :  { %677 = vmatpush3.bf16.msra.mxu0 %v733_v57 }
  0x43   :  { %532 = vmatmul.mubr.bf16.vlgmr.msra.gmra.mrb[4].mxu0 %v33_v59 }
  0xf6   :  { %v634_v61 = vpop.f32.mrb[0].mxu0 }
  0xf7   :  { %v656_v62 = vpop.f32.mrb[0].mxu1  ;;  %v635_v63 = vpop.f32.mrb[1].mxu0 }
  0xf8   :  { %v657_v0 = vpop.f32.mrb[1].mxu1  ;;  %v636_v1 = vadd.f32 %v635_v63, %v634_v61  ;;  %v637_v3 = vpop.f32.mrb[2].mxu0 }
  0xf9   :  { %v658_v2 = vadd.f32 %v657_v0, %v656_v62  ;;  %v659_v4 = vpop.f32.mrb[2].mxu1  ;;  %v638_v5 = vpop.f32.mrb[3].mxu0 }
  0xfa   :  { %v660_v6 = vpop.f32.mrb[3].mxu1 }
  0xfb   :  { %v494_v7 = vadd.f32 %v658_v2, %v636_v1 }
 0x116   :  { %v678_v8 = vpop.f32.mrb[4].mxu0 }
 0x117   :  { %v679_v9 = vpop.f32.mrb[5].mxu0 }
 0x118   :  { %v680_v10 = vadd.f32 %v679_v9, %v678_v8  ;;  %v681_v11 = vpop.f32.mrb[6].mxu0 }
 0x119   :  { %v682_v12 = vpop.f32.mrb[7].mxu0 }
 0x11a   :  { %v534_v14 = vadd.f32 %v680_v10, %v494_v7 }
 0x11c   :  { %v539_v15 = vadd.f32 %v534_v14, %v22_v13 }
 0x11e   :  { %541 = vst.msk [vmem:[#allocation2] sm:$0xff] %vm20_vm0, %v539_v15 }
 0x125   :  { %v545_v17 = vld [vmem:[#allocation2] sm:$0xff] }
 0x126   :  { %v553_v18 = vadd.f32 %v617_v16, %v545_v17 }
 0x128   :  { %554 = vst.msk [vmem:[#allocation3] sm:$0xff] %vm20_vm0, %v553_v18 }
 0x129   :  { %745 = shalt.err (!%p742_p4)
}
 0x12a   :  { %s746_s17 = scalar_lea.hbm %s963_s3, 128 }
 0x12b   :  { %p747_p5 = scmp.ne.s32.totalorder %s963_s3, %s746_s17  ;;  %p750_p6 = scmp.lt.u32.totalorder %s746_s17, %s963_s3 }
 0x12d   :  { %p752_p7 = pnand %p750_p6, %p747_p5 }
 0x12f   :  { %755 = shalt.err (!%p752_p7)
}
 0x130   :  { %564 = dma.vmem_to_hbm [thread:$0]  %s562_s13, 128, %s963_s3, [#allocation4]  }
 0x131   :  { %756 = dma.done.wait [#allocation4], 128  }
 0x132   :  { %757 = vsyncadd [#allocation4], 4294967168 }
 0x133   :  { %568 = vsyncpa [#allocation4], 1 }

</bundles_post_ra>
